<compile_context>
chip_gen: v7x
topology: tpu7x:2x2x1
jax: 0.10.0
libtpu: 0.0.40
codegen_flags: <defaults>
</compile_context>

<pallas_src>
import jax
import jax.numpy as jnp
from jax.experimental import pallas as pl
from jax.experimental.pallas import tpu as pltpu

_MIB = 1024 * 1024


def decoder_kernel(h_ref, w1_ref, b1_ref, w2_ref, b2_ref, w3_ref, b3_ref, o_ref):
    # Cast the activation tile to bf16 here (not in the wrapper) so the only
    # HBM traffic for h is the f32 tile DMA -- no extra wrapper-side copy.
    x = h_ref[...].astype(jnp.bfloat16)

    # Linear(input -> hidden) + Tanh   (bf16 MXU operands, f32 accumulate)
    z1 = jnp.dot(x, w1_ref[...], preferred_element_type=jnp.float32) + b1_ref[...]
    a1 = jnp.tanh(z1)

    # Linear(hidden -> hidden) + Tanh
    z2 = jnp.dot(a1.astype(jnp.bfloat16), w2_ref[...],
                 preferred_element_type=jnp.float32) + b2_ref[...]
    a2 = jnp.tanh(z2)

    # Linear(hidden -> output) + Sigmoid.
    z3 = jnp.dot(a2.astype(jnp.bfloat16), w3_ref[...],
                 preferred_element_type=jnp.float32) + b3_ref[...]
    # sigmoid(z) = 0.5 * tanh(0.5 * z) + 0.5: a single EUP push per element
    # (vs exp + reciprocal) and exact to EUP precision.
    o_ref[...] = (0.5 * jnp.tanh(0.5 * z3) + 0.5).astype(o_ref.dtype)


def _round_up(x, m):
    return ((x + m - 1) // m) * m


def _cdiv(a, b):
    return (a + b - 1) // b


def _pad2(a, rows, cols, dtype):
    pr, pc = rows - a.shape[0], cols - a.shape[1]
    if pr or pc:
        a = jnp.pad(a, ((0, pr), (0, pc)))
    return a.astype(dtype)


def _tpu_topology():
    """Best-effort (tensorcores_per_chip, vmem_capacity_bytes); conservative fallback."""
    vmem_cap = 64 * _MIB      # safe default (v7x physical VMEM)
    num_cores = 1
    try:
        info = pltpu.get_tpu_info()
        vmem_cap = int(getattr(info, "vmem_capacity_bytes", vmem_cap))
    except Exception:
        pass
    try:
        kind = jax.devices()[0].device_kind.lower()
        if "v7" in kind:
            num_cores = 2
            vmem_cap = min(vmem_cap, 64 * _MIB)
    except Exception:
        pass
    return num_cores, vmem_cap


def _build_decoder_call(B, in_dim, hid_p, out_dim, tile, grid,
                        vmem_limit_bytes, buffered_weights):
    def const_spec(shape):
        # Constant index_map -> fetched once; single-buffer so weights don't
        # occupy 2x their size in VMEM.
        if buffered_weights:
            return pl.BlockSpec(shape, lambda i: (0, 0),
                                pipeline_mode=pl.Buffered(1))
        return pl.BlockSpec(shape, lambda i: (0, 0))

    in_specs = [
        pl.BlockSpec((tile, in_dim), lambda i: (i, 0)),   # h (batch-tiled)
        const_spec((in_dim, hid_p)),                      # w1 (resident)
        const_spec((1, hid_p)),                           # b1
        const_spec((hid_p, hid_p)),                       # w2
        const_spec((1, hid_p)),                           # b2
        const_spec((hid_p, out_dim)),                     # w3
        const_spec((1, out_dim)),                         # b3
    ]
    out_spec = pl.BlockSpec((tile, out_dim), lambda i: (i, 0))

    return pl.pallas_call(
        decoder_kernel,
        out_shape=jax.ShapeDtypeStruct((B, out_dim), jnp.float32),
        grid_spec=pltpu.PrefetchScalarGridSpec(
            num_scalar_prefetch=0,
            grid=grid,
            in_specs=in_specs,
            out_specs=out_spec,
        ),
        compiler_params=pltpu.CompilerParams(
            dimension_semantics=("parallel",),
            vmem_limit_bytes=vmem_limit_bytes,
        ),
    )


def decoder_forward(h, params, *, batch_tile=None, vmem_limit_bytes=None):
    """h: [B, input_dim] float32. params: weights as [in, out], biases as [1, out]."""
    w1, b1, w2, b2, w3, b3 = (params["w1"], params["b1"], params["w2"],
                              params["b2"], params["w3"], params["b3"])
    B, in_dim = h.shape
    hid = w1.shape[1]
    out_dim = w3.shape[1]

    LANE, SUB = 128, 16          # lane width; bf16-packed sublane group
    hid_p = _round_up(hid, LANE)

    num_cores, vmem_cap = _tpu_topology()
    if vmem_limit_bytes is None:
        vmem_limit_bytes = (3 * vmem_cap) // 4
    if batch_tile is None:
        # 128-MiB-VMEM parts (v5e/v6e) take 512-row tiles; 256 elsewhere (v7x).
        batch_tile = 512 if vmem_cap >= 96 * _MIB else 256

    # Batch tiling. Small batches: one tile per TensorCore (v7x has 2 -- don't
    # leave one idle), otherwise a single grid step (per-step overhead ~0.35us).
    # Large batches: MXU-filling tiles; grid = cdiv(B, tile) so the partial last
    # block is masked by Pallas -- no wrapper-side batch padding or output slice.
    if B <= batch_tile:
        n_tiles = num_cores if (num_cores > 1 and B >= 2 * SUB) else 1
        tile = _round_up(_cdiv(B, n_tiles), SUB)
    else:
        tile = batch_tile
    grid = (_cdiv(B, tile),)

    # Zero-pad only the (small, one-time) weights to a lane-dense hidden dim:
    # padded hidden cols see zero weights + zero bias -> tanh(0) = 0 -> hit zero
    # rows of the next layer, so math on real columns is exact. Input and output
    # feature dims keep their true size (full-dim blocks, no padding/slicing).
    w1_p = _pad2(w1, in_dim, hid_p, jnp.bfloat16)
    b1_p = _pad2(b1, 1, hid_p, jnp.float32)
    w2_p = _pad2(w2, hid_p, hid_p, jnp.bfloat16)
    b2_p = _pad2(b2, 1, hid_p, jnp.float32)
    w3_p = _pad2(w3, hid_p, out_dim, jnp.bfloat16)
    b3_p = _pad2(b3, 1, out_dim, jnp.float32)

    # TODO(synk): for very large hidden dims add a second ("arbitrary") grid axis
    # that streams w2 column-slabs / w3 row-slabs through an f32 accumulator in
    # scratch (pl.when init/finalize), and consider fp8 weights on v7x.

    args = (h, w1_p, b1_p, w2_p, b2_p, w3_p, b3_p)
    last_err = None
    for buffered_weights in (True, False):
        try:
            call = _build_decoder_call(B, in_dim, hid_p, out_dim, tile, grid,
                                       vmem_limit_bytes, buffered_weights)
            out = call(*args)
            return jax.block_until_ready(out)
        except Exception as err:  # fallback if pl.Buffered(1) is unsupported
            last_err = err
    raise last_err


def init_decoder_params(key, input_dim, hidden_dim, output_dim):
    """PyTorch nn.Linear-style uniform init; weights stored as [in, out]."""
    ks = jax.random.split(key, 6)

    def linear(kw, kb, fan_in, fan_out):
        bound = 1.0 / jnp.sqrt(fan_in)
        w = jax.random.uniform(kw, (fan_in, fan_out), jnp.float32, -bound, bound)
        b = jax.random.uniform(kb, (1, fan_out), jnp.float32, -bound, bound)
        return w, b

    w1, b1 = linear(ks[0], ks[1], input_dim, hidden_dim)
    w2, b2 = linear(ks[2], ks[3], hidden_dim, hidden_dim)
    w3, b3 = linear(ks[4], ks[5], hidden_dim, output_dim)
    return {"w1": w1, "b1": b1, "w2": w2, "b2": b2, "w3": w3, "b3": b3}


if __name__ == "__main__":
    # Small shapes consistent with the module's forward: h is [batch, input_dim].
    batch, input_dim, hidden_dim_, output_dim = 16, 32, 200, 16

    key = jax.random.PRNGKey(0)
    k_h, k_p = jax.random.split(key)
    h = jax.random.normal(k_h, (batch, input_dim), dtype=jnp.float32)
    params = init_decoder_params(k_p, input_dim, hidden_dim_, output_dim)

    out = decoder_forward(h, params)
    out = jax.block_until_ready(out)

    # Reference check in plain f32 JAX (kernel uses bf16 MXU operands with f32
    # accumulation, so tolerance is relaxed a bit).
    ref = jax.nn.sigmoid(
        jnp.tanh(
            jnp.tanh(h @ params["w1"] + params["b1"]) @ params["w2"] + params["b2"]
        )
        @ params["w3"]
        + params["b3"]
    )
    assert out.shape == (batch, output_dim)
    assert jnp.allclose(out, ref, atol=2e-2), "mismatch vs reference"

    print("KERNEL_OK")
</pallas_src>

<mosaic_0001>
module attributes {stable_mosaic.version = 11 : i64} {
  func.func @decoder_kernel(%arg0: i32, %arg1: memref<16x32xf32, #tpu.memory_space<vmem>>, %arg2: memref<32x256xbf16, #tpu.memory_space<vmem>>, %arg3: memref<1x256xf32, #tpu.memory_space<vmem>>, %arg4: memref<256x256xbf16, #tpu.memory_space<vmem>>, %arg5: memref<1x256xf32, #tpu.memory_space<vmem>>, %arg6: memref<256x16xbf16, #tpu.memory_space<vmem>>, %arg7: memref<1x16xf32, #tpu.memory_space<vmem>>, %arg8: memref<16x16xf32, #tpu.memory_space<vmem>>) attributes {dimension_semantics = [#tpu.dimension_semantics<parallel>], iteration_bounds = array<i64: 1>, scalar_prefetch = 0 : i64, scratch_operands = 0 : i64, tpu.core_type = #tpu.core_type<tc>, window_params = [{transform_indices = @transform_0, window_bounds = array<i64: 16, 32>}, {pipeline_mode = #tpu.pipeline_mode<synchronous>, transform_indices = @transform_1, window_bounds = array<i64: 32, 256>}, {pipeline_mode = #tpu.pipeline_mode<synchronous>, transform_indices = @transform_2, window_bounds = array<i64: 1, 256>}, {pipeline_mode = #tpu.pipeline_mode<synchronous>, transform_indices = @transform_3, window_bounds = array<i64: 256, 256>}, {pipeline_mode = #tpu.pipeline_mode<synchronous>, transform_indices = @transform_4, window_bounds = array<i64: 1, 256>}, {pipeline_mode = #tpu.pipeline_mode<synchronous>, transform_indices = @transform_5, window_bounds = array<i64: 256, 16>}, {pipeline_mode = #tpu.pipeline_mode<synchronous>, transform_indices = @transform_6, window_bounds = array<i64: 1, 16>}, {transform_indices = @transform_7, window_bounds = array<i64: 16, 16>}]} {
    %c0 = arith.constant 0 : index
    %c0_0 = arith.constant 0 : index
    %0 = vector.load %arg1[%c0, %c0_0] : memref<16x32xf32, #tpu.memory_space<vmem>>, vector<16x32xf32>
    %1 = arith.truncf %0 : vector<16x32xf32> to vector<16x32xbf16>
    %c0_1 = arith.constant 0 : index
    %c0_2 = arith.constant 0 : index
    %2 = vector.load %arg2[%c0_1, %c0_2] : memref<32x256xbf16, #tpu.memory_space<vmem>>, vector<32x256xbf16>
    %cst = arith.constant dense<0.000000e+00> : vector<16x256xf32>
    %3 = tpu.matmul %1, %2, %cst {dimension_numbers = #tpu.dot_dimension_numbers<[1], [0], [0], [1], [0, 0, 1, 1], [], []>} : vector<16x32xbf16>, vector<32x256xbf16>, vector<16x256xf32> -> vector<16x256xf32>
    %c0_3 = arith.constant 0 : index
    %c0_4 = arith.constant 0 : index
    %4 = vector.load %arg3[%c0_3, %c0_4] : memref<1x256xf32, #tpu.memory_space<vmem>>, vector<1x256xf32>
    %5 = vector.broadcast %4 : vector<1x256xf32> to vector<16x256xf32>
    %6 = arith.addf %3, %5 : vector<16x256xf32>
    %7 = math.tanh %6 : vector<16x256xf32>
    %8 = arith.truncf %7 : vector<16x256xf32> to vector<16x256xbf16>
    %c0_5 = arith.constant 0 : index
    %c0_6 = arith.constant 0 : index
    %9 = vector.load %arg4[%c0_5, %c0_6] : memref<256x256xbf16, #tpu.memory_space<vmem>>, vector<256x256xbf16>
    %cst_7 = arith.constant dense<0.000000e+00> : vector<16x256xf32>
    %10 = tpu.matmul %8, %9, %cst_7 {dimension_numbers = #tpu.dot_dimension_numbers<[1], [0], [0], [1], [0, 0, 1, 1], [], []>} : vector<16x256xbf16>, vector<256x256xbf16>, vector<16x256xf32> -> vector<16x256xf32>
    %c0_8 = arith.constant 0 : index
    %c0_9 = arith.constant 0 : index
    %11 = vector.load %arg5[%c0_8, %c0_9] : memref<1x256xf32, #tpu.memory_space<vmem>>, vector<1x256xf32>
    %12 = vector.broadcast %11 : vector<1x256xf32> to vector<16x256xf32>
    %13 = arith.addf %10, %12 : vector<16x256xf32>
    %14 = math.tanh %13 : vector<16x256xf32>
    %15 = arith.truncf %14 : vector<16x256xf32> to vector<16x256xbf16>
    %c0_10 = arith.constant 0 : index
    %c0_11 = arith.constant 0 : index
    %16 = vector.load %arg6[%c0_10, %c0_11] : memref<256x16xbf16, #tpu.memory_space<vmem>>, vector<256x16xbf16>
    %cst_12 = arith.constant dense<0.000000e+00> : vector<16x16xf32>
    %17 = tpu.matmul %15, %16, %cst_12 {dimension_numbers = #tpu.dot_dimension_numbers<[1], [0], [0], [1], [0, 0, 1, 1], [], []>} : vector<16x256xbf16>, vector<256x16xbf16>, vector<16x16xf32> -> vector<16x16xf32>
    %c0_13 = arith.constant 0 : index
    %c0_14 = arith.constant 0 : index
    %18 = vector.load %arg7[%c0_13, %c0_14] : memref<1x16xf32, #tpu.memory_space<vmem>>, vector<1x16xf32>
    %19 = vector.broadcast %18 : vector<1x16xf32> to vector<16x16xf32>
    %20 = arith.addf %17, %19 : vector<16x16xf32>
    %cst_15 = arith.constant 5.000000e-01 : f32
    %21 = vector.broadcast %cst_15 : f32 to vector<16x16xf32>
    %22 = arith.mulf %21, %20 : vector<16x16xf32>
    %23 = math.tanh %22 : vector<16x16xf32>
    %cst_16 = arith.constant 5.000000e-01 : f32
    %24 = vector.broadcast %cst_16 : f32 to vector<16x16xf32>
    %25 = arith.mulf %24, %23 : vector<16x16xf32>
    %cst_17 = arith.constant 5.000000e-01 : f32
    %26 = vector.broadcast %cst_17 : f32 to vector<16x16xf32>
    %27 = arith.addf %25, %26 : vector<16x16xf32>
    %c0_18 = arith.constant 0 : index
    %c0_19 = arith.constant 0 : index
    %28 = vector.load %arg8[%c0_18, %c0_19] : memref<16x16xf32, #tpu.memory_space<vmem>>, vector<16x16xf32>
    tpu.vector_store %arg8[%c0_18, %c0_19], %27 {strides = array<i32>} : memref<16x16xf32, #tpu.memory_space<vmem>>, vector<16x16xf32>,
    return
  }
  func.func @transform_0(%arg0: i32) -> (i32, i32) {
    %c0_i32 = arith.constant 0 : i32
    %c0_i32_0 = arith.constant 0 : i32
    return %arg0, %c0_i32 : i32, i32
  }
  func.func @transform_1(%arg0: i32) -> (i32, i32) {
    %c0_i32 = arith.constant 0 : i32
    %c0_i32_0 = arith.constant 0 : i32
    %c0_i32_1 = arith.constant 0 : i32
    return %c0_i32, %c0_i32_0 : i32, i32
  }
  func.func @transform_2(%arg0: i32) -> (i32, i32) {
    %c0_i32 = arith.constant 0 : i32
    %c0_i32_0 = arith.constant 0 : i32
    %c0_i32_1 = arith.constant 0 : i32
    return %c0_i32, %c0_i32_0 : i32, i32
  }
  func.func @transform_3(%arg0: i32) -> (i32, i32) {
    %c0_i32 = arith.constant 0 : i32
    %c0_i32_0 = arith.constant 0 : i32
    %c0_i32_1 = arith.constant 0 : i32
    return %c0_i32, %c0_i32_0 : i32, i32
  }
  func.func @transform_4(%arg0: i32) -> (i32, i32) {
    %c0_i32 = arith.constant 0 : i32
    %c0_i32_0 = arith.constant 0 : i32
    %c0_i32_1 = arith.constant 0 : i32
    return %c0_i32, %c0_i32_0 : i32, i32
  }
  func.func @transform_5(%arg0: i32) -> (i32, i32) {
    %c0_i32 = arith.constant 0 : i32
    %c0_i32_0 = arith.constant 0 : i32
    %c0_i32_1 = arith.constant 0 : i32
    return %c0_i32, %c0_i32_0 : i32, i32
  }
  func.func @transform_6(%arg0: i32) -> (i32, i32) {
    %c0_i32 = arith.constant 0 : i32
    %c0_i32_0 = arith.constant 0 : i32
    %c0_i32_1 = arith.constant 0 : i32
    return %c0_i32, %c0_i32_0 : i32, i32
  }
  func.func @transform_7(%arg0: i32) -> (i32, i32) {
    %c0_i32 = arith.constant 0 : i32
    %c0_i32_0 = arith.constant 0 : i32
    return %arg0, %c0_i32 : i32, i32
  }
}

module attributes {stable_mosaic.version = 11 : i64} {
  func.func @decoder_kernel(%arg0: i32, %arg1: memref<16x32xf32, #tpu.memory_space<vmem>>, %arg2: memref<32x256xbf16, #tpu.memory_space<vmem>>, %arg3: memref<1x256xf32, #tpu.memory_space<vmem>>, %arg4: memref<256x256xbf16, #tpu.memory_space<vmem>>, %arg5: memref<1x256xf32, #tpu.memory_space<vmem>>, %arg6: memref<256x16xbf16, #tpu.memory_space<vmem>>, %arg7: memref<1x16xf32, #tpu.memory_space<vmem>>, %arg8: memref<16x16xf32, #tpu.memory_space<vmem>>) attributes {dimension_semantics = [#tpu.dimension_semantics<parallel>], iteration_bounds = array<i64: 1>, scalar_prefetch = 0 : i64, scratch_operands = 0 : i64, tpu.core_type = #tpu.core_type<tc>, window_params = [{transform_indices = @transform_0, window_bounds = array<i64: 16, 32>}, {pipeline_mode = #tpu.pipeline_mode<synchronous>, transform_indices = @transform_1, window_bounds = array<i64: 32, 256>}, {pipeline_mode = #tpu.pipeline_mode<synchronous>, transform_indices = @transform_2, window_bounds = array<i64: 1, 256>}, {pipeline_mode = #tpu.pipeline_mode<synchronous>, transform_indices = @transform_3, window_bounds = array<i64: 256, 256>}, {pipeline_mode = #tpu.pipeline_mode<synchronous>, transform_indices = @transform_4, window_bounds = array<i64: 1, 256>}, {pipeline_mode = #tpu.pipeline_mode<synchronous>, transform_indices = @transform_5, window_bounds = array<i64: 256, 16>}, {pipeline_mode = #tpu.pipeline_mode<synchronous>, transform_indices = @transform_6, window_bounds = array<i64: 1, 16>}, {transform_indices = @transform_7, window_bounds = array<i64: 16, 16>}]} {
    %c0 = arith.constant 0 : index
    %c0_0 = arith.constant 0 : index
    %0 = vector.load %arg1[%c0, %c0_0] : memref<16x32xf32, #tpu.memory_space<vmem>>, vector<16x32xf32>
    %1 = arith.truncf %0 : vector<16x32xf32> to vector<16x32xbf16>
    %c0_1 = arith.constant 0 : index
    %c0_2 = arith.constant 0 : index
    %2 = vector.load %arg2[%c0_1, %c0_2] : memref<32x256xbf16, #tpu.memory_space<vmem>>, vector<32x256xbf16>
    %cst = arith.constant dense<0.000000e+00> : vector<16x256xf32>
    %3 = tpu.matmul %1, %2, %cst {dimension_numbers = #tpu.dot_dimension_numbers<[1], [0], [0], [1], [0, 0, 1, 1], [], []>} : vector<16x32xbf16>, vector<32x256xbf16>, vector<16x256xf32> -> vector<16x256xf32>
    %c0_3 = arith.constant 0 : index
    %c0_4 = arith.constant 0 : index
    %4 = vector.load %arg3[%c0_3, %c0_4] : memref<1x256xf32, #tpu.memory_space<vmem>>, vector<1x256xf32>
    %5 = vector.broadcast %4 : vector<1x256xf32> to vector<16x256xf32>
    %6 = arith.addf %3, %5 : vector<16x256xf32>
    %7 = math.tanh %6 : vector<16x256xf32>
    %8 = arith.truncf %7 : vector<16x256xf32> to vector<16x256xbf16>
    %c0_5 = arith.constant 0 : index
    %c0_6 = arith.constant 0 : index
    %9 = vector.load %arg4[%c0_5, %c0_6] : memref<256x256xbf16, #tpu.memory_space<vmem>>, vector<256x256xbf16>
    %cst_7 = arith.constant dense<0.000000e+00> : vector<16x256xf32>
    %10 = tpu.matmul %8, %9, %cst_7 {dimension_numbers = #tpu.dot_dimension_numbers<[1], [0], [0], [1], [0, 0, 1, 1], [], []>} : vector<16x256xbf16>, vector<256x256xbf16>, vector<16x256xf32> -> vector<16x256xf32>
    %c0_8 = arith.constant 0 : index
    %c0_9 = arith.constant 0 : index
    %11 = vector.load %arg5[%c0_8, %c0_9] : memref<1x256xf32, #tpu.memory_space<vmem>>, vector<1x256xf32>
    %12 = vector.broadcast %11 : vector<1x256xf32> to vector<16x256xf32>
    %13 = arith.addf %10, %12 : vector<16x256xf32>
    %14 = math.tanh %13 : vector<16x256xf32>
    %15 = arith.truncf %14 : vector<16x256xf32> to vector<16x256xbf16>
    %c0_10 = arith.constant 0 : index
    %c0_11 = arith.constant 0 : index
    %16 = vector.load %arg6[%c0_10, %c0_11] : memref<256x16xbf16, #tpu.memory_space<vmem>>, vector<256x16xbf16>
    %cst_12 = arith.constant dense<0.000000e+00> : vector<16x16xf32>
    %17 = tpu.matmul %15, %16, %cst_12 {dimension_numbers = #tpu.dot_dimension_numbers<[1], [0], [0], [1], [0, 0, 1, 1], [], []>} : vector<16x256xbf16>, vector<256x16xbf16>, vector<16x16xf32> -> vector<16x16xf32>
    %c0_13 = arith.constant 0 : index
    %c0_14 = arith.constant 0 : index
    %18 = vector.load %arg7[%c0_13, %c0_14] : memref<1x16xf32, #tpu.memory_space<vmem>>, vector<1x16xf32>
    %19 = vector.broadcast %18 : vector<1x16xf32> to vector<16x16xf32>
    %20 = arith.addf %17, %19 : vector<16x16xf32>
    %cst_15 = arith.constant 5.000000e-01 : f32
    %21 = vector.broadcast %cst_15 : f32 to vector<16x16xf32>
    %22 = arith.mulf %21, %20 : vector<16x16xf32>
    %23 = math.tanh %22 : vector<16x16xf32>
    %cst_16 = arith.constant 5.000000e-01 : f32
    %24 = vector.broadcast %cst_16 : f32 to vector<16x16xf32>
    %25 = arith.mulf %24, %23 : vector<16x16xf32>
    %cst_17 = arith.constant 5.000000e-01 : f32
    %26 = vector.broadcast %cst_17 : f32 to vector<16x16xf32>
    %27 = arith.addf %25, %26 : vector<16x16xf32>
    %c0_18 = arith.constant 0 : index
    %c0_19 = arith.constant 0 : index
    %28 = vector.load %arg8[%c0_18, %c0_19] : memref<16x16xf32, #tpu.memory_space<vmem>>, vector<16x16xf32>
    tpu.vector_store %arg8[%c0_18, %c0_19], %27 {strides = array<i32>} : memref<16x16xf32, #tpu.memory_space<vmem>>, vector<16x16xf32>,
    return
  }
  func.func @transform_0(%arg0: i32) -> (i32, i32) {
    %c0_i32 = arith.constant 0 : i32
    %c0_i32_0 = arith.constant 0 : i32
    return %arg0, %c0_i32 : i32, i32
  }
  func.func @transform_1(%arg0: i32) -> (i32, i32) {
    %c0_i32 = arith.constant 0 : i32
    %c0_i32_0 = arith.constant 0 : i32
    %c0_i32_1 = arith.constant 0 : i32
    return %c0_i32, %c0_i32_0 : i32, i32
  }
  func.func @transform_2(%arg0: i32) -> (i32, i32) {
    %c0_i32 = arith.constant 0 : i32
    %c0_i32_0 = arith.constant 0 : i32
    %c0_i32_1 = arith.constant 0 : i32
    return %c0_i32, %c0_i32_0 : i32, i32
  }
  func.func @transform_3(%arg0: i32) -> (i32, i32) {
    %c0_i32 = arith.constant 0 : i32
    %c0_i32_0 = arith.constant 0 : i32
    %c0_i32_1 = arith.constant 0 : i32
    return %c0_i32, %c0_i32_0 : i32, i32
  }
  func.func @transform_4(%arg0: i32) -> (i32, i32) {
    %c0_i32 = arith.constant 0 : i32
    %c0_i32_0 = arith.constant 0 : i32
    %c0_i32_1 = arith.constant 0 : i32
    return %c0_i32, %c0_i32_0 : i32, i32
  }
  func.func @transform_5(%arg0: i32) -> (i32, i32) {
    %c0_i32 = arith.constant 0 : i32
    %c0_i32_0 = arith.constant 0 : i32
    %c0_i32_1 = arith.constant 0 : i32
    return %c0_i32, %c0_i32_0 : i32, i32
  }
  func.func @transform_6(%arg0: i32) -> (i32, i32) {
    %c0_i32 = arith.constant 0 : i32
    %c0_i32_0 = arith.constant 0 : i32
    %c0_i32_1 = arith.constant 0 : i32
    return %c0_i32, %c0_i32_0 : i32, i32
  }
  func.func @transform_7(%arg0: i32) -> (i32, i32) {
    %c0_i32 = arith.constant 0 : i32
    %c0_i32_0 = arith.constant 0 : i32
    return %arg0, %c0_i32 : i32, i32
  }
}

</mosaic_0001>

<bundles_post_ra>
// kernel: tpu_custom_call.1
= control target key start
LH: loop header
LB: loop body
LE: loop exit
PB: predicated region body
PF: predicated region fallthrough
CT: control target
= control target key end

     0   :  { %12 = vsyncpa [#allocation3], 0  ;;  %s960_s0 = inlined_call_operand.vmem [shape: f32[16,32], index: 0, kind: input, shape index: {}]   ;;  %s961_s1 = inlined_call_operand.vmem [shape: bf16[32,256], index: 1, kind: input, shape index: {}]   ;;  %s962_s2 = inlined_call_operand.vmem [shape: f32[1,256], index: 2, kind: input, shape index: {}]   ;;  %s963_s3 = inlined_call_operand.hbm [shape: bf16[256,256], index: 3, kind: input, shape index: {}]   ;;  %s964_s4 = inlined_call_operand.vmem [shape: f32[1,256], index: 4, kind: input, shape index: {}]   ;;  %s965_s5 = inlined_call_operand.vmem [shape: bf16[256,16], index: 5, kind: input, shape index: {}]   ;;  %s966_s6 = inlined_call_operand.vmem [shape: f32[1,16], index: 6, kind: input, shape index: {}]   ;;  %s967_s7 = inlined_call_operand.hbm [shape: f32[16,16], index: 7, kind: output, shape index: {}]  }
   0x1   :  { %13 = vsyncpa [#allocation4], 0  ;;  %s810_s24 = smov [#allocation2]   ;;  %s762_s28 = scalar_lea.hbm %s963_s3, 4096 }
   0x2   :  { %s25_s25 = sshll.u32 %s810_s24, 4  ;;  %p763_p0 = scmp.ne.s32.totalorder %s963_s3, %s762_s28  ;;  %s26_s25 = int_to_ptr.vmem [resolvable:$true] %s25_s25 }
   0x3   :  { %p766_p1 = scmp.lt.u32.totalorder %s762_s28, %s963_s3 }
   0x5   :  { %p768_p2 = pnand %p766_p1, %p763_p0 }
   0x7   :  { %771 = shalt.err (!%p768_p2)
}
   0x8   :  { %s772_s10 = scalar_lea.vmem %s26_s25, 4096  ;;  %p777_p4 = scmp.lt.s32.totalorder %s26_s25, %s26_s25 }
   0x9   :  { %p773_p3 = scmp.ne.s32.totalorder %s26_s25, %s772_s10  ;;  %p778_p5 = scmp.lt.s32.totalorder %s772_s10, %s772_s10 }
   0xb   :  { %p779_p6 = por %p778_p5, %p777_p4 }
   0xd   :  { %p780_p7 = pnand %p779_p6, %p773_p3 }
   0xf   :  { %783 = shalt.err (!%p780_p7)
}
  0x10   :  { %s811_s11 = smov 128   ;;  %s812_s12 = smov 8  }
  0x11   :  { %31 = dma.hbm_to_vmem [thread:$0]  %s963_s3, 4096, %s26_s25, [#allocation3], %s811_s11, %s811_s11, %s812_s12  }
  0x12   :  { %806 = dma.done.wait [#allocation3], 4096  }
  0x13   :  { %807 = vsyncadd [#allocation3], 4294963200  ;;  %v813_v0 = vmov 0   ;;  %v672_v1 = vld [vmem:[%s961_s1 + $0x4] ss:$8 sps:$4 sm:$0xff]   ;;  %vm81_vm0 = vcmask 261120   ;;  %v51_v46 = vlaneseq }
  0x14   :  { %117 = vmatprep.mubr.bf16.mxu0 %v813_v0  ;;  %v674_v2 = vld [vmem:[%s961_s1] ss:$8 sps:$4 sm:$0xff]   ;;  %85 = vmatprep.subr.bf16.mxu0 %v672_v1  ;;  %v675_v3 = vld [vmem:[%s961_s1 + $0x14] ss:$8 sps:$4 sm:$0xff]   ;;  %v677_v4 = vld [vmem:[%s961_s1 + $0x10] ss:$8 sps:$4 sm:$0xff]  }
  0x15   :  { %v42_v5 = vld [vmem:[%s960_s0] sm:$0xff]  ;;  %86 = vmatpush1.bf16.msra.mxu0 %v674_v2  ;;  %v43_v6 = vld [vmem:[%s960_s0 + $0x8] sm:$0xff]  ;;  %v681_v9 = vld [vmem:[#allocation2 + $0x14] ss:$8 sps:$4 sm:$0xff]   ;;  %v52_v47 = vshrl.u32 %v51_v46, 7  ;;  %vm571_vm1 = vcmask 130048  }
  0x16   :  { %87 = vmatprep.subr.bf16.mxu0 %v675_v3  ;;  %v678_v7 = vld [vmem:[#allocation2 + $0x4] ss:$8 sps:$4 sm:$0xff]   ;;  %v680_v8 = vld [vmem:[#allocation2] ss:$8 sps:$4 sm:$0xff]   ;;  %v44_v10 = vpack.c.bf16 %v43_v6, %v42_v5  ;;  %v683_v11 = vld [vmem:[#allocation2 + $0x10] ss:$8 sps:$4 sm:$0xff]  }
  0x17   :  { %338 = vmatprep.subr.bf16.mxu1 %v678_v7  ;;  %v684_v12 = vld [vmem:[#allocation2 + $0x24] ss:$8 sps:$4 sm:$0xff]   ;;  %v686_v13 = vld [vmem:[#allocation2 + $0x20] ss:$8 sps:$4 sm:$0xff]   ;;  %v687_v14 = vld [vmem:[#allocation2 + $0x34] ss:$8 sps:$4 sm:$0xff]  }
  0x18   :  { %339 = vmatpush1.bf16.msra.mxu1 %v680_v8  ;;  %v689_v15 = vld [vmem:[#allocation2 + $0x30] ss:$8 sps:$4 sm:$0xff]   ;;  %v690_v16 = vld [vmem:[#allocation2 + $0x44] ss:$8 sps:$4 sm:$0xff]   ;;  %v692_v17 = vld [vmem:[#allocation2 + $0x40] ss:$8 sps:$4 sm:$0xff]  }
  0x19   :  { %88 = vmatpush1.bf16.msra.mxu0 %v677_v4  ;;  %340 = vmatprep.subr.bf16.mxu1 %v681_v9  ;;  %v693_v18 = vld [vmem:[#allocation2 + $0x54] ss:$8 sps:$4 sm:$0xff]   ;;  %v695_v19 = vld [vmem:[#allocation2 + $0x50] ss:$8 sps:$4 sm:$0xff]   ;;  %v696_v20 = vld [vmem:[#allocation2 + $0x64] ss:$8 sps:$4 sm:$0xff]  }
  0x1a   :  { %v698_v21 = vld [vmem:[#allocation2 + $0x60] ss:$8 sps:$4 sm:$0xff]   ;;  %v699_v22 = vld [vmem:[#allocation2 + $0x74] ss:$8 sps:$4 sm:$0xff]   ;;  %v701_v23 = vld [vmem:[#allocation2 + $0x70] ss:$8 sps:$4 sm:$0xff]  }
  0x1b   :  { %v702_v24 = vld [vmem:[#allocation2 + $0x84] ss:$8 sps:$4 sm:$0xff]   ;;  %v704_v25 = vld [vmem:[#allocation2 + $0x80] ss:$8 sps:$4 sm:$0xff]   ;;  %v705_v26 = vld [vmem:[#allocation2 + $0x94] ss:$8 sps:$4 sm:$0xff]  }
  0x1c   :  { %595 = vmatmul.mubr.msk.bf16.vlgmr.msra.gmra.mrb[0].mxu0 %vm81_vm0, %v44_v10  ;;  %341 = vmatpush1.bf16.msra.mxu1 %v683_v11  ;;  %v707_v27 = vld [vmem:[#allocation2 + $0x90] ss:$8 sps:$4 sm:$0xff]   ;;  %v708_v28 = vld [vmem:[#allocation2 + $0xa4] ss:$8 sps:$4 sm:$0xff]   ;;  %v710_v29 = vld [vmem:[#allocation2 + $0xa0] ss:$8 sps:$4 sm:$0xff]  }
  0x1d   :  { %342 = vmatprep.subr.bf16.mxu1 %v684_v12  ;;  %v711_v30 = vld [vmem:[#allocation2 + $0xb4] ss:$8 sps:$4 sm:$0xff]   ;;  %v713_v31 = vld [vmem:[#allocation2 + $0xb0] ss:$8 sps:$4 sm:$0xff]   ;;  %v714_v32 = vld [vmem:[#allocation2 + $0xc4] ss:$8 sps:$4 sm:$0xff]  }
  0x1e   :  { %v716_v33 = vld [vmem:[#allocation2 + $0xc0] ss:$8 sps:$4 sm:$0xff]   ;;  %v717_v34 = vld [vmem:[#allocation2 + $0xd4] ss:$8 sps:$4 sm:$0xff]   ;;  %v719_v35 = vld [vmem:[#allocation2 + $0xd0] ss:$8 sps:$4 sm:$0xff]  }
  0x1f   :  { %v720_v36 = vld [vmem:[#allocation2 + $0xe4] ss:$8 sps:$4 sm:$0xff]   ;;  %v722_v37 = vld [vmem:[#allocation2 + $0xe0] ss:$8 sps:$4 sm:$0xff]   ;;  %v723_v38 = vld [vmem:[#allocation2 + $0xf4] ss:$8 sps:$4 sm:$0xff]  }
  0x20   :  { %343 = vmatpush1.bf16.msra.mxu1 %v686_v13  ;;  %v725_v39 = vld [vmem:[#allocation2 + $0xf0] ss:$8 sps:$4 sm:$0xff]   ;;  %v726_v40 = vld [vmem:[%s965_s5 + $0x40] sm:$0xff]   ;;  %v728_v42 = vld [vmem:[%s965_s5 + $0x48] sm:$0xff]   ;;  %v53_v48 = vsub.s32 0, %v52_v47  ;;  %v57_v50 = vsub.s32 1, %v52_v47 }
  0x21   :  { %344 = vmatprep.subr.bf16.mxu1 %v687_v14  ;;  %v727_v41 = vld [vmem:[%s965_s5] sm:$0xff]   ;;  %645 = vmatprep.subr.bf16.mxu0 %v726_v40  ;;  %v729_v43 = vld [vmem:[%s965_s5 + $0x8] sm:$0xff]   ;;  %v730_v44 = vld [vmem:[%s965_s5 + $0x50] sm:$0xff]   ;;  %s814_s14 = smov [#allocation5]  }
  0x22   :  { %646 = vmatpush3.bf16.msra.mxu0 %v727_v41  ;;  %v731_v45 = vld [vmem:[%s965_s5 + $0x10] sm:$0xff]   ;;  %v49_v49 = vld [vmem:[%s962_s2] sm:$0x3]  ;;  %v732_v3 = vld [vmem:[%s965_s5 + $0x58] sm:$0xff]   ;;  %s579_s15 = sshll.u32 %s814_s14, 4  ;;  %s580_s15 = int_to_ptr.vmem [resolvable:$true] %s579_s15 }
  0x23   :  { %647 = vmatprep.subr.bf16.mxu0 %v728_v42  ;;  %v54_v51 = vrot.slane %v49_v49, %v53_v48  ;;  %v58_v52 = vrot.slane %v49_v49, %v57_v50  ;;  %v733_v4 = vld [vmem:[%s965_s5 + $0x18] sm:$0xff]   ;;  %v734_v5 = vld [vmem:[%s965_s5 + $0x60] sm:$0xff]   ;;  %v736_v7 = vld [vmem:[%s965_s5 + $0x68] sm:$0xff]   ;;  %p789_p9 = scmp.lt.s32.totalorder %s580_s15, %s580_s15 }
  0x24   :  { %345 = vmatpush1.bf16.msra.mxu1 %v689_v15  ;;  %v735_v6 = vld [vmem:[%s965_s5 + $0x20] sm:$0xff]   ;;  %v737_v8 = vld [vmem:[%s965_s5 + $0x28] sm:$0xff]   ;;  %v738_v9 = vld [vmem:[%s965_s5 + $0x70] sm:$0xff]  }
  0x25   :  { %346 = vmatprep.subr.bf16.mxu1 %v690_v16  ;;  %v739_v10 = vld [vmem:[%s965_s5 + $0x30] sm:$0xff]   ;;  %v740_v11 = vld [vmem:[%s965_s5 + $0x78] sm:$0xff]   ;;  %v166_v13 = vld [vmem:[%s964_s4] sm:$0x3] }
  0x26   :  { %648 = vmatpush3.bf16.msra.mxu0 %v729_v43  ;;  %v741_v12 = vld [vmem:[%s965_s5 + $0x38] sm:$0xff]   ;;  %v171_v14 = vrot.slane %v166_v13, %v53_v48  ;;  %v175_v15 = vrot.slane %v166_v13, %v57_v50 }
  0x27   :  { %649 = vmatprep.subr.bf16.mxu0 %v730_v44 }
  0x28   :  { %347 = vmatpush1.bf16.msra.mxu1 %v692_v17 }
  0x29   :  { %348 = vmatprep.subr.bf16.mxu1 %v693_v18 }
  0x2a   :  { %650 = vmatpush3.bf16.msra.mxu0 %v731_v45 }
  0x2b   :  { %651 = vmatprep.subr.bf16.mxu0 %v732_v3 }
  0x2c   :  { %349 = vmatpush1.bf16.msra.mxu1 %v695_v19 }
  0x2d   :  { %350 = vmatprep.subr.bf16.mxu1 %v696_v20 }
  0x2e   :  { %652 = vmatpush3.bf16.msra.mxu0 %v733_v4 }
  0x2f   :  { %653 = vmatprep.subr.bf16.mxu0 %v734_v5 }
  0x30   :  { %351 = vmatpush1.bf16.msra.mxu1 %v698_v21 }
  0x31   :  { %352 = vmatprep.subr.bf16.mxu1 %v699_v22 }
  0x32   :  { %654 = vmatpush3.bf16.msra.mxu0 %v735_v6 }
  0x33   :  { %655 = vmatprep.subr.bf16.mxu0 %v736_v7 }
  0x34   :  { %353 = vmatpush1.bf16.msra.mxu1 %v701_v23 }
  0x35   :  { %354 = vmatprep.subr.bf16.mxu1 %v702_v24 }
  0x36   :  { %656 = vmatpush3.bf16.msra.mxu0 %v737_v8 }
  0x37   :  { %657 = vmatprep.subr.bf16.mxu0 %v738_v9 }
  0x38   :  { %355 = vmatpush1.bf16.msra.mxu1 %v704_v25 }
  0x39   :  { %356 = vmatprep.subr.bf16.mxu1 %v705_v26 }
  0x3a   :  { %658 = vmatpush3.bf16.msra.mxu0 %v739_v10 }
  0x3b   :  { %659 = vmatprep.subr.bf16.mxu0 %v740_v11 }
  0x3c   :  { %357 = vmatpush1.bf16.msra.mxu1 %v707_v27 }
  0x3d   :  { %358 = vmatprep.subr.bf16.mxu1 %v708_v28 }
  0x3e   :  { %660 = vmatpush3.bf16.msra.mxu0 %v741_v12 }
  0x40   :  { %359 = vmatpush1.bf16.msra.mxu1 %v710_v29 }
  0x41   :  { %360 = vmatprep.subr.bf16.mxu1 %v711_v30 }
  0x44   :  { %361 = vmatpush1.bf16.msra.mxu1 %v713_v31  ;;  %v628_v31 = vld [vmem:[%s966_s6] ss:$0 sm:$0xff]  ;;  %s784_s6 = scalar_lea.vmem %s580_s15, 256 }
  0x45   :  { %362 = vmatprep.subr.bf16.mxu1 %v714_v32  ;;  %p785_p8 = scmp.ne.s32.totalorder %s580_s15, %s784_s6  ;;  %p790_p10 = scmp.lt.s32.totalorder %s784_s6, %s784_s6 }
  0x47   :  { %p791_p11 = por %p790_p10, %p789_p9 }
  0x48   :  { %363 = vmatpush1.bf16.msra.mxu1 %v716_v33 }
  0x49   :  { %364 = vmatprep.subr.bf16.mxu1 %v717_v34  ;;  %p792_p12 = pnand %p791_p11, %p785_p8 }
  0x4c   :  { %365 = vmatpush1.bf16.msra.mxu1 %v719_v35 }
  0x4d   :  { %366 = vmatprep.subr.bf16.mxu1 %v720_v36 }
  0x50   :  { %367 = vmatpush1.bf16.msra.mxu1 %v722_v37 }
  0x51   :  { %368 = vmatprep.subr.bf16.mxu1 %v723_v38 }
  0x54   :  { %369 = vmatpush1.bf16.msra.mxu1 %v725_v39 }
  0xef   :  { %v119_v53 = vpop.f32.mrb[0].mxu0 }
  0xf0   :  { %v120_v54 = vadd.f32 %v119_v53, %v54_v51  ;;  %v121_v55 = vpop.f32.mrb[1].mxu0 }
  0xf1   :  { %v122_v56 = vadd.f32 %v121_v55, %v58_v52  ;;  %v123_v57 = vpop.f32.mrb[2].mxu0 }
  0xf2   :  { %742 = vtanh.f32 %v120_v54  ;;  %v124_v58 = vadd.f32 %v123_v57, %v54_v51  ;;  %v125_v59 = vpop.f32.mrb[3].mxu0 }
  0xf3   :  { %744 = vtanh.f32 %v122_v56  ;;  %v126_v60 = vadd.f32 %v125_v59, %v58_v52 }
  0xf4   :  { %746 = vtanh.f32 %v124_v58 }
  0xf5   :  { %748 = vtanh.f32 %v126_v60 }
  0xfc   :  { %v743_v61 = vpop.eup %742 }
  0xfd   :  { %v745_v62 = vpop.eup %744 }
  0xfe   :  { %v747_v63 = vpop.eup %746 }
  0xff   :  { %v749_v0 = vpop.eup %748  ;;  %v132_v1 = vpack.c.bf16 %v747_v63, %v743_v61 }
 0x100   :  { %v133_v2 = vpack.c.bf16 %v749_v0, %v745_v62 }
 0x102   :  { %370 = vmatprep.mubr.bf16.mxu1 %v133_v2 }
 0x103   :  { %371 = vmatmul.mubr.bf16.vlgmr.msra.gmra.mrb[0].mxu1 %v132_v1 }
 0x1d6   :  { %v372_v16 = vpop.f32.mrb[0].mxu1 }
 0x1d7   :  { %v373_v17 = vadd.f32 %v372_v16, %v171_v14  ;;  %v374_v18 = vpop.f32.mrb[1].mxu1 }
 0x1d8   :  { %v375_v19 = vadd.f32 %v374_v18, %v175_v15  ;;  %v376_v20 = vpop.f32.mrb[2].mxu1 }
 0x1d9   :  { %750 = vtanh.f32 %v373_v17  ;;  %v377_v21 = vadd.f32 %v376_v20, %v171_v14  ;;  %v378_v22 = vpop.f32.mrb[3].mxu1 }
 0x1da   :  { %752 = vtanh.f32 %v375_v19  ;;  %v379_v23 = vadd.f32 %v378_v22, %v175_v15 }
 0x1db   :  { %754 = vtanh.f32 %v377_v21 }
 0x1dc   :  { %756 = vtanh.f32 %v379_v23 }
 0x1e3   :  { %v751_v24 = vpop.eup %750 }
 0x1e4   :  { %v753_v25 = vpop.eup %752 }
 0x1e5   :  { %v755_v26 = vpop.eup %754 }
 0x1e6   :  { %v757_v27 = vpop.eup %756  ;;  %v385_v28 = vpack.c.bf16 %v755_v26, %v751_v24 }
 0x1e7   :  { %v386_v29 = vpack.c.bf16 %v757_v27, %v753_v25 }
 0x1e9   :  { %554 = vmatprep.mubr.bf16.mxu0 %v386_v29 }
 0x1ea   :  { %555 = vmatmul.mubr.bf16.vlgmr.msra.gmra.mrb[4].mxu0 %v385_v28 }
 0x2bd   :  { %v661_v30 = vpop.f32.mrb[4].mxu0 }
 0x2be   :  { %v662_v32 = vpop.f32.mrb[5].mxu0 }
 0x2bf   :  { %v663_v33 = vadd.f32 %v662_v32, %v661_v30  ;;  %v664_v34 = vpop.f32.mrb[6].mxu0 }
 0x2c0   :  { %v665_v35 = vpop.f32.mrb[7].mxu0 }
 0x2c1   :  { %v557_v36 = vadd.f32 %v663_v33, %v628_v31  ;;  %v666_v37 = vadd.f32 %v665_v35, %v664_v34 }
 0x2c3   :  { %v563_v38 = vmul.f32 0.5, %v557_v36  ;;  %v560_v39 = vadd.f32 %v666_v37, %v628_v31 }
 0x2c5   :  { %758 = vtanh.f32 %v563_v38  ;;  %v564_v40 = vmul.f32 0.5, %v560_v39 }
 0x2c7   :  { %760 = vtanh.f32 %v564_v40 }
 0x2cf   :  { %v759_v41 = vpop.eup %758 }
 0x2d0   :  { %v567_v42 = vmul.f32 0.5, %v759_v41 }
 0x2d1   :  { %v761_v43 = vpop.eup %760 }
 0x2d2   :  { %v569_v44 = vadd.f32 0.5, %v567_v42  ;;  %v568_v45 = vmul.f32 0.5, %v761_v43 }
 0x2d4   :  { %v570_v46 = vadd.f32 0.5, %v568_v45  ;;  %572 = vst.msk [vmem:[#allocation5] sm:$0xff] %vm571_vm1, %v569_v44 }
 0x2d6   :  { %573 = vst.msk [vmem:[#allocation5 + $0x8] sm:$0xff] %vm571_vm1, %v570_v46 }
 0x2d7   :  { %795 = shalt.err (!%p792_p12)
}
 0x2d8   :  { %s796_s17 = scalar_lea.hbm %s967_s7, 256 }
 0x2d9   :  { %p797_p13 = scmp.ne.s32.totalorder %s967_s7, %s796_s17  ;;  %p800_p0 = scmp.lt.u32.totalorder %s796_s17, %s967_s7 }
 0x2db   :  { %p802_p1 = pnand %p800_p0, %p797_p13 }
 0x2dd   :  { %805 = shalt.err (!%p802_p1)
}
 0x2de   :  { %585 = dma.vmem_to_hbm [thread:$0]  %s580_s15, 256, %s967_s7, [#allocation4], %s811_s11, %s811_s11, %s812_s12  }
 0x2df   :  { %808 = dma.done.wait [#allocation4], 256  }
 0x2e0   :  { %809 = vsyncadd [#allocation4], 4294967040 }
 0x2e1   :  { %589 = vsyncpa [#allocation3], 1 }
 0x2e2   :  { %590 = vsyncpa [#allocation4], 1 }

// kernel: tpu_custom_call.1
= control target key start
LH: loop header
LB: loop body
LE: loop exit
PB: predicated region body
PF: predicated region fallthrough
CT: control target
= control target key end

     0   :  { %12 = vsyncpa [#allocation3], 0  ;;  %s960_s0 = inlined_call_operand.vmem [shape: f32[16,32], index: 0, kind: input, shape index: {}]   ;;  %s961_s1 = inlined_call_operand.vmem [shape: bf16[32,256], index: 1, kind: input, shape index: {}]   ;;  %s962_s2 = inlined_call_operand.vmem [shape: f32[1,256], index: 2, kind: input, shape index: {}]   ;;  %s963_s3 = inlined_call_operand.hbm [shape: bf16[256,256], index: 3, kind: input, shape index: {}]   ;;  %s964_s4 = inlined_call_operand.vmem [shape: f32[1,256], index: 4, kind: input, shape index: {}]   ;;  %s965_s5 = inlined_call_operand.vmem [shape: bf16[256,16], index: 5, kind: input, shape index: {}]   ;;  %s966_s6 = inlined_call_operand.vmem [shape: f32[1,16], index: 6, kind: input, shape index: {}]   ;;  %s967_s7 = inlined_call_operand.hbm [shape: f32[16,16], index: 7, kind: output, shape index: {}]  }
   0x1   :  { %13 = vsyncpa [#allocation4], 0  ;;  %s810_s24 = smov [#allocation2]   ;;  %s762_s28 = scalar_lea.hbm %s963_s3, 4096 }
   0x2   :  { %s25_s25 = sshll.u32 %s810_s24, 4  ;;  %p763_p0 = scmp.ne.s32.totalorder %s963_s3, %s762_s28  ;;  %s26_s25 = int_to_ptr.vmem [resolvable:$true] %s25_s25 }
   0x3   :  { %p766_p1 = scmp.lt.u32.totalorder %s762_s28, %s963_s3 }
   0x5   :  { %p768_p2 = pnand %p766_p1, %p763_p0 }
   0x7   :  { %771 = shalt.err (!%p768_p2)
}
   0x8   :  { %s772_s10 = scalar_lea.vmem %s26_s25, 4096  ;;  %p777_p4 = scmp.lt.s32.totalorder %s26_s25, %s26_s25 }
   0x9   :  { %p773_p3 = scmp.ne.s32.totalorder %s26_s25, %s772_s10  ;;  %p778_p5 = scmp.lt.s32.totalorder %s772_s10, %s772_s10 }
   0xb   :  { %p779_p6 = por %p778_p5, %p777_p4 }
   0xd   :  { %p780_p7 = pnand %p779_p6, %p773_p3 }
   0xf   :  { %783 = shalt.err (!%p780_p7)
}
  0x10   :  { %s811_s11 = smov 128   ;;  %s812_s12 = smov 8  }
  0x11   :  { %31 = dma.hbm_to_vmem [thread:$0]  %s963_s3, 4096, %s26_s25, [#allocation3], %s811_s11, %s811_s11, %s812_s12  }
  0x12   :  { %806 = dma.done.wait [#allocation3], 4096  }
  0x13   :  { %807 = vsyncadd [#allocation3], 4294963200  ;;  %v813_v0 = vmov 0   ;;  %v672_v1 = vld [vmem:[%s961_s1 + $0x4] ss:$8 sps:$4 sm:$0xff]   ;;  %vm81_vm0 = vcmask 261120   ;;  %v51_v46 = vlaneseq }
  0x14   :  { %117 = vmatprep.mubr.bf16.mxu0 %v813_v0  ;;  %v674_v2 = vld [vmem:[%s961_s1] ss:$8 sps:$4 sm:$0xff]   ;;  %85 = vmatprep.subr.bf16.mxu0 %v672_v1  ;;  %v675_v3 = vld [vmem:[%s961_s1 + $0x14] ss:$8 sps:$4 sm:$0xff]   ;;  %v677_v4 = vld [vmem:[%s961_s1 + $0x10] ss:$8 sps:$4 sm:$0xff]  }
  0x15   :  { %v42_v5 = vld [vmem:[%s960_s0] sm:$0xff]  ;;  %86 = vmatpush1.bf16.msra.mxu0 %v674_v2  ;;  %v43_v6 = vld [vmem:[%s960_s0 + $0x8] sm:$0xff]  ;;  %v681_v9 = vld [vmem:[#allocation2 + $0x14] ss:$8 sps:$4 sm:$0xff]   ;;  %v52_v47 = vshrl.u32 %v51_v46, 7  ;;  %vm571_vm1 = vcmask 130048  }
  0x16   :  { %87 = vmatprep.subr.bf16.mxu0 %v675_v3  ;;  %v678_v7 = vld [vmem:[#allocation2 + $0x4] ss:$8 sps:$4 sm:$0xff]   ;;  %v680_v8 = vld [vmem:[#allocation2] ss:$8 sps:$4 sm:$0xff]   ;;  %v44_v10 = vpack.c.bf16 %v43_v6, %v42_v5  ;;  %v683_v11 = vld [vmem:[#allocation2 + $0x10] ss:$8 sps:$4 sm:$0xff]  }
  0x17   :  { %338 = vmatprep.subr.bf16.mxu1 %v678_v7  ;;  %v684_v12 = vld [vmem:[#allocation2 + $0x24] ss:$8 sps:$4 sm:$0xff]   ;;  %v686_v13 = vld [vmem:[#allocation2 + $0x20] ss:$8 sps:$4 sm:$0xff]   ;;  %v687_v14 = vld [vmem:[#allocation2 + $0x34] ss:$8 sps:$4 sm:$0xff]  }
  0x18   :  { %339 = vmatpush1.bf16.msra.mxu1 %v680_v8  ;;  %v689_v15 = vld [vmem:[#allocation2 + $0x30] ss:$8 sps:$4 sm:$0xff]   ;;  %v690_v16 = vld [vmem:[#allocation2 + $0x44] ss:$8 sps:$4 sm:$0xff]   ;;  %v692_v17 = vld [vmem:[#allocation2 + $0x40] ss:$8 sps:$4 sm:$0xff]  }
  0x19   :  { %88 = vmatpush1.bf16.msra.mxu0 %v677_v4  ;;  %340 = vmatprep.subr.bf16.mxu1 %v681_v9  ;;  %v693_v18 = vld [vmem:[#allocation2 + $0x54] ss:$8 sps:$4 sm:$0xff]   ;;  %v695_v19 = vld [vmem:[#allocation2 + $0x50] ss:$8 sps:$4 sm:$0xff]   ;;  %v696_v20 = vld [vmem:[#allocation2 + $0x64] ss:$8 sps:$4 sm:$0xff]  }
  0x1a   :  { %v698_v21 = vld [vmem:[#allocation2 + $0x60] ss:$8 sps:$4 sm:$0xff]   ;;  %v699_v22 = vld [vmem:[#allocation2 + $0x74] ss:$8 sps:$4 sm:$0xff]   ;;  %v701_v23 = vld [vmem:[#allocation2 + $0x70] ss:$8 sps:$4 sm:$0xff]  }
  0x1b   :  { %v702_v24 = vld [vmem:[#allocation2 + $0x84] ss:$8 sps:$4 sm:$0xff]   ;;  %v704_v25 = vld [vmem:[#allocation2 + $0x80] ss:$8 sps:$4 sm:$0xff]   ;;  %v705_v26 = vld [vmem:[#allocation2 + $0x94] ss:$8 sps:$4 sm:$0xff]  }
  0x1c   :  { %595 = vmatmul.mubr.msk.bf16.vlgmr.msra.gmra.mrb[0].mxu0 %vm81_vm0, %v44_v10  ;;  %341 = vmatpush1.bf16.msra.mxu1 %v683_v11  ;;  %v707_v27 = vld [vmem:[#allocation2 + $0x90] ss:$8 sps:$4 sm:$0xff]   ;;  %v708_v28 = vld [vmem:[#allocation2 + $0xa4] ss:$8 sps:$4 sm:$0xff]   ;;  %v710_v29 = vld [vmem:[#allocation2 + $0xa0] ss:$8 sps:$4 sm:$0xff]  }
  0x1d   :  { %342 = vmatprep.subr.bf16.mxu1 %v684_v12  ;;  %v711_v30 = vld [vmem:[#allocation2 + $0xb4] ss:$8 sps:$4 sm:$0xff]   ;;  %v713_v31 = vld [vmem:[#allocation2 + $0xb0] ss:$8 sps:$4 sm:$0xff]   ;;  %v714_v32 = vld [vmem:[#allocation2 + $0xc4] ss:$8 sps:$4 sm:$0xff]  }
  0x1e   :  { %v716_v33 = vld [vmem:[#allocation2 + $0xc0] ss:$8 sps:$4 sm:$0xff]   ;;  %v717_v34 = vld [vmem:[#allocation2 + $0xd4] ss:$8 sps:$4 sm:$0xff]   ;;  %v719_v35 = vld [vmem:[#allocation2 + $0xd0] ss:$8 sps:$4 sm:$0xff]  }
  0x1f   :  { %v720_v36 = vld [vmem:[#allocation2 + $0xe4] ss:$8 sps:$4 sm:$0xff]   ;;  %v722_v37 = vld [vmem:[#allocation2 + $0xe0] ss:$8 sps:$4 sm:$0xff]   ;;  %v723_v38 = vld [vmem:[#allocation2 + $0xf4] ss:$8 sps:$4 sm:$0xff]  }
  0x20   :  { %343 = vmatpush1.bf16.msra.mxu1 %v686_v13  ;;  %v725_v39 = vld [vmem:[#allocation2 + $0xf0] ss:$8 sps:$4 sm:$0xff]   ;;  %v726_v40 = vld [vmem:[%s965_s5 + $0x40] sm:$0xff]   ;;  %v728_v42 = vld [vmem:[%s965_s5 + $0x48] sm:$0xff]   ;;  %v53_v48 = vsub.s32 0, %v52_v47  ;;  %v57_v50 = vsub.s32 1, %v52_v47 }
  0x21   :  { %344 = vmatprep.subr.bf16.mxu1 %v687_v14  ;;  %v727_v41 = vld [vmem:[%s965_s5] sm:$0xff]   ;;  %645 = vmatprep.subr.bf16.mxu0 %v726_v40  ;;  %v729_v43 = vld [vmem:[%s965_s5 + $0x8] sm:$0xff]   ;;  %v730_v44 = vld [vmem:[%s965_s5 + $0x50] sm:$0xff]   ;;  %s814_s14 = smov [#allocation5]  }
  0x22   :  { %646 = vmatpush3.bf16.msra.mxu0 %v727_v41  ;;  %v731_v45 = vld [vmem:[%s965_s5 + $0x10] sm:$0xff]   ;;  %v49_v49 = vld [vmem:[%s962_s2] sm:$0x3]  ;;  %v732_v3 = vld [vmem:[%s965_s5 + $0x58] sm:$0xff]   ;;  %s579_s15 = sshll.u32 %s814_s14, 4  ;;  %s580_s15 = int_to_ptr.vmem [resolvable:$true] %s579_s15 }
  0x23   :  { %647 = vmatprep.subr.bf16.mxu0 %v728_v42  ;;  %v54_v51 = vrot.slane %v49_v49, %v53_v48  ;;  %v58_v52 = vrot.slane %v49_v49, %v57_v50  ;;  %v733_v4 = vld [vmem:[%s965_s5 + $0x18] sm:$0xff]   ;;  %v734_v5 = vld [vmem:[%s965_s5 + $0x60] sm:$0xff]   ;;  %v736_v7 = vld [vmem:[%s965_s5 + $0x68] sm:$0xff]   ;;  %p789_p9 = scmp.lt.s32.totalorder %s580_s15, %s580_s15 }
  0x24   :  { %345 = vmatpush1.bf16.msra.mxu1 %v689_v15  ;;  %v735_v6 = vld [vmem:[%s965_s5 + $0x20] sm:$0xff]   ;;  %v737_v8 = vld [vmem:[%s965_s5 + $0x28] sm:$0xff]   ;;  %v738_v9 = vld [vmem:[%s965_s5 + $0x70] sm:$0xff]  }
  0x25   :  { %346 = vmatprep.subr.bf16.mxu1 %v690_v16  ;;  %v739_v10 = vld [vmem:[%s965_s5 + $0x30] sm:$0xff]   ;;  %v740_v11 = vld [vmem:[%s965_s5 + $0x78] sm:$0xff]   ;;  %v166_v13 = vld [vmem:[%s964_s4] sm:$0x3] }
  0x26   :  { %648 = vmatpush3.bf16.msra.mxu0 %v729_v43  ;;  %v741_v12 = vld [vmem:[%s965_s5 + $0x38] sm:$0xff]   ;;  %v171_v14 = vrot.slane %v166_v13, %v53_v48  ;;  %v175_v15 = vrot.slane %v166_v13, %v57_v50 }
  0x27   :  { %649 = vmatprep.subr.bf16.mxu0 %v730_v44 }
  0x28   :  { %347 = vmatpush1.bf16.msra.mxu1 %v692_v17 }
  0x29   :  { %348 = vmatprep.subr.bf16.mxu1 %v693_v18 }
  0x2a   :  { %650 = vmatpush3.bf16.msra.mxu0 %v731_v45 }
  0x2b   :  { %651 = vmatprep.subr.bf16.mxu0 %v732_v3 }
  0x2c   :  { %349 = vmatpush1.bf16.msra.mxu1 %v695_v19 }
  0x2d   :  { %350 = vmatprep.subr.bf16.mxu1 %v696_v20 }
  0x2e   :  { %652 = vmatpush3.bf16.msra.mxu0 %v733_v4 }
  0x2f   :  { %653 = vmatprep.subr.bf16.mxu0 %v734_v5 }
  0x30   :  { %351 = vmatpush1.bf16.msra.mxu1 %v698_v21 }
  0x31   :  { %352 = vmatprep.subr.bf16.mxu1 %v699_v22 }
  0x32   :  { %654 = vmatpush3.bf16.msra.mxu0 %v735_v6 }
  0x33   :  { %655 = vmatprep.subr.bf16.mxu0 %v736_v7 }
  0x34   :  { %353 = vmatpush1.bf16.msra.mxu1 %v701_v23 }
  0x35   :  { %354 = vmatprep.subr.bf16.mxu1 %v702_v24 }
  0x36   :  { %656 = vmatpush3.bf16.msra.mxu0 %v737_v8 }
  0x37   :  { %657 = vmatprep.subr.bf16.mxu0 %v738_v9 }
  0x38   :  { %355 = vmatpush1.bf16.msra.mxu1 %v704_v25 }
  0x39   :  { %356 = vmatprep.subr.bf16.mxu1 %v705_v26 }
  0x3a   :  { %658 = vmatpush3.bf16.msra.mxu0 %v739_v10 }
  0x3b   :  { %659 = vmatprep.subr.bf16.mxu0 %v740_v11 }
  0x3c   :  { %357 = vmatpush1.bf16.msra.mxu1 %v707_v27 }
  0x3d   :  { %358 = vmatprep.subr.bf16.mxu1 %v708_v28 }
  0x3e   :  { %660 = vmatpush3.bf16.msra.mxu0 %v741_v12 }
  0x40   :  { %359 = vmatpush1.bf16.msra.mxu1 %v710_v29 }
  0x41   :  { %360 = vmatprep.subr.bf16.mxu1 %v711_v30 }
  0x44   :  { %361 = vmatpush1.bf16.msra.mxu1 %v713_v31  ;;  %v628_v31 = vld [vmem:[%s966_s6] ss:$0 sm:$0xff]  ;;  %s784_s6 = scalar_lea.vmem %s580_s15, 256 }
  0x45   :  { %362 = vmatprep.subr.bf16.mxu1 %v714_v32  ;;  %p785_p8 = scmp.ne.s32.totalorder %s580_s15, %s784_s6  ;;  %p790_p10 = scmp.lt.s32.totalorder %s784_s6, %s784_s6 }
  0x47   :  { %p791_p11 = por %p790_p10, %p789_p9 }
  0x48   :  { %363 = vmatpush1.bf16.msra.mxu1 %v716_v33 }
  0x49   :  { %364 = vmatprep.subr.bf16.mxu1 %v717_v34  ;;  %p792_p12 = pnand %p791_p11, %p785_p8 }
  0x4c   :  { %365 = vmatpush1.bf16.msra.mxu1 %v719_v35 }
  0x4d   :  { %366 = vmatprep.subr.bf16.mxu1 %v720_v36 }
  0x50   :  { %367 = vmatpush1.bf16.msra.mxu1 %v722_v37 }
  0x51   :  { %368 = vmatprep.subr.bf16.mxu1 %v723_v38 }
  0x54   :  { %369 = vmatpush1.bf16.msra.mxu1 %v725_v39 }
  0xef   :  { %v119_v53 = vpop.f32.mrb[0].mxu0 }
  0xf0   :  { %v120_v54 = vadd.f32 %v119_v53, %v54_v51  ;;  %v121_v55 = vpop.f32.mrb[1].mxu0 }
  0xf1   :  { %v122_v56 = vadd.f32 %v121_v55, %v58_v52  ;;  %v123_v57 = vpop.f32.mrb[2].mxu0 }
  0xf2   :  { %742 = vtanh.f32 %v120_v54  ;;  %v124_v58 = vadd.f32 %v123_v57, %v54_v51  ;;  %v125_v59 = vpop.f32.mrb[3].mxu0 }
  0xf3   :  { %744 = vtanh.f32 %v122_v56  ;;  %v126_v60 = vadd.f32 %v125_v59, %v58_v52 }
  0xf4   :  { %746 = vtanh.f32 %v124_v58 }
  0xf5   :  { %748 = vtanh.f32 %v126_v60 }
  0xfc   :  { %v743_v61 = vpop.eup %742 }
  0xfd   :  { %v745_v62 = vpop.eup %744 }
  0xfe   :  { %v747_v63 = vpop.eup %746 }
  0xff   :  { %v749_v0 = vpop.eup %748  ;;  %v132_v1 = vpack.c.bf16 %v747_v63, %v743_v61 }
 0x100   :  { %v133_v2 = vpack.c.bf16 %v749_v0, %v745_v62 }
 0x102   :  { %370 = vmatprep.mubr.bf16.mxu1 %v133_v2 }
 0x103   :  { %371 = vmatmul.mubr.bf16.vlgmr.msra.gmra.mrb[0].mxu1 %v132_v1 }
 0x1d6   :  { %v372_v16 = vpop.f32.mrb[0].mxu1 }
 0x1d7   :  { %v373_v17 = vadd.f32 %v372_v16, %v171_v14  ;;  %v374_v18 = vpop.f32.mrb[1].mxu1 }
 0x1d8   :  { %v375_v19 = vadd.f32 %v374_v18, %v175_v15  ;;  %v376_v20 = vpop.f32.mrb[2].mxu1 }
 0x1d9   :  { %750 = vtanh.f32 %v373_v17  ;;  %v377_v21 = vadd.f32 %v376_v20, %v171_v14  ;;  %v378_v22 = vpop.f32.mrb[3].mxu1 }
 0x1da   :  { %752 = vtanh.f32 %v375_v19  ;;  %v379_v23 = vadd.f32 %v378_v22, %v175_v15 }
 0x1db   :  { %754 = vtanh.f32 %v377_v21 }
 0x1dc   :  { %756 = vtanh.f32 %v379_v23 }
 0x1e3   :  { %v751_v24 = vpop.eup %750 }
 0x1e4   :  { %v753_v25 = vpop.eup %752 }
 0x1e5   :  { %v755_v26 = vpop.eup %754 }
 0x1e6   :  { %v757_v27 = vpop.eup %756  ;;  %v385_v28 = vpack.c.bf16 %v755_v26, %v751_v24 }
 0x1e7   :  { %v386_v29 = vpack.c.bf16 %v757_v27, %v753_v25 }
 0x1e9   :  { %554 = vmatprep.mubr.bf16.mxu0 %v386_v29 }
 0x1ea   :  { %555 = vmatmul.mubr.bf16.vlgmr.msra.gmra.mrb[4].mxu0 %v385_v28 }
 0x2bd   :  { %v661_v30 = vpop.f32.mrb[4].mxu0 }
 0x2be   :  { %v662_v32 = vpop.f32.mrb[5].mxu0 }
 0x2bf   :  { %v663_v33 = vadd.f32 %v662_v32, %v661_v30  ;;  %v664_v34 = vpop.f32.mrb[6].mxu0 }
 0x2c0   :  { %v665_v35 = vpop.f32.mrb[7].mxu0 }
 0x2c1   :  { %v557_v36 = vadd.f32 %v663_v33, %v628_v31  ;;  %v666_v37 = vadd.f32 %v665_v35, %v664_v34 }
 0x2c3   :  { %v563_v38 = vmul.f32 0.5, %v557_v36  ;;  %v560_v39 = vadd.f32 %v666_v37, %v628_v31 }
 0x2c5   :  { %758 = vtanh.f32 %v563_v38  ;;  %v564_v40 = vmul.f32 0.5, %v560_v39 }
 0x2c7   :  { %760 = vtanh.f32 %v564_v40 }
 0x2cf   :  { %v759_v41 = vpop.eup %758 }
 0x2d0   :  { %v567_v42 = vmul.f32 0.5, %v759_v41 }
 0x2d1   :  { %v761_v43 = vpop.eup %760 }
 0x2d2   :  { %v569_v44 = vadd.f32 0.5, %v567_v42  ;;  %v568_v45 = vmul.f32 0.5, %v761_v43 }
 0x2d4   :  { %v570_v46 = vadd.f32 0.5, %v568_v45  ;;  %572 = vst.msk [vmem:[#allocation5] sm:$0xff] %vm571_vm1, %v569_v44 }
 0x2d6   :  { %573 = vst.msk [vmem:[#allocation5 + $0x8] sm:$0xff] %vm571_vm1, %v570_v46 }
 0x2d7   :  { %795 = shalt.err (!%p792_p12)
}
 0x2d8   :  { %s796_s17 = scalar_lea.hbm %s967_s7, 256 }
 0x2d9   :  { %p797_p13 = scmp.ne.s32.totalorder %s967_s7, %s796_s17  ;;  %p800_p0 = scmp.lt.u32.totalorder %s796_s17, %s967_s7 }
 0x2db   :  { %p802_p1 = pnand %p800_p0, %p797_p13 }
 0x2dd   :  { %805 = shalt.err (!%p802_p1)
}
 0x2de   :  { %585 = dma.vmem_to_hbm [thread:$0]  %s580_s15, 256, %s967_s7, [#allocation4], %s811_s11, %s811_s11, %s812_s12  }
 0x2df   :  { %808 = dma.done.wait [#allocation4], 256  }
 0x2e0   :  { %809 = vsyncadd [#allocation4], 4294967040 }
 0x2e1   :  { %589 = vsyncpa [#allocation3], 1 }
 0x2e2   :  { %590 = vsyncpa [#allocation4], 1 }

</bundles_post_ra>
